<compile_context>
chip_gen: v7x
topology: tpu7x:2x2x1
jax: 0.10.0
libtpu: 0.0.40
codegen_flags: <defaults>
</compile_context>

<pallas_src>
import jax
import jax.numpy as jnp
import numpy as np
from jax.experimental import pallas as pl
from jax.experimental.pallas import tpu as pltpu

_LANE = 128     # lane padding granularity for the (VMEM-only) hidden dim
_SUBLANE = 8    # batch-tile rows must be a multiple of this


def _round_up(n, m):
    return ((n + m - 1) // m) * m


def _pad2d(a, rows, cols):
    r, c = a.shape
    if r == rows and c == cols:
        return a
    return jnp.pad(a, ((0, rows - r), (0, cols - c)))


def decoder_sv_kernel(q_ref, w1_ref, b1_ref, w2_ref, b2_ref, w3_ref, o_ref):
    """relu(q@W1+b1) -> relu(.@W2+b2) -> .@W3 for one batch tile (f32 accumulation).

    Operand casts to `cdt` happen only immediately before each dot (bf16 path stays off
    the f32-only VPU on v5e); all elementwise epilogue math is f32.
    """
    cdt = w1_ref.dtype
    x = q_ref[...].astype(cdt)                                   # mirrors q_.float()
    h1 = jnp.maximum(
        jnp.dot(x, w1_ref[...], preferred_element_type=jnp.float32) + b1_ref[...], 0.0)
    h2 = jnp.maximum(
        jnp.dot(h1.astype(cdt), w2_ref[...], preferred_element_type=jnp.float32)
        + b2_ref[...], 0.0)
    o_ref[...] = jnp.dot(h2.astype(cdt), w3_ref[...],
                         preferred_element_type=jnp.float32).astype(o_ref.dtype)


def prepare_decoder_params(w1, b1, w2, b2, w3, *, param_dtype=jnp.float32):
    """One-time parameter prep (pad hidden dim to 128 lanes, cast weights).

    Weights are stored (in, out) = transpose of nn.Linear.weight; biases are (out,).
    Call this once at load time; pass the result to decoder_sv_forward every step.
    Use param_dtype=jnp.bfloat16 for the MXU fast path on v6e/v7x (also valid on v5e).
    """
    q_dim, hid = w1.shape
    x_dim = w3.shape[1]
    hid_p = _round_up(hid, _LANE)

    return dict(
        w1=_pad2d(jnp.asarray(w1, param_dtype), q_dim, hid_p),
        w2=_pad2d(jnp.asarray(w2, param_dtype), hid_p, hid_p),
        w3=_pad2d(jnp.asarray(w3, param_dtype), hid_p, x_dim),
        b1=_pad2d(jnp.asarray(b1, jnp.float32).reshape(1, hid), 1, hid_p),
        b2=_pad2d(jnp.asarray(b2, jnp.float32).reshape(1, hid), 1, hid_p),
        q_dim=q_dim, hid=hid, hid_p=hid_p, x_dim=x_dim,
    )


def decoder_sv_forward(q, params, *, block_rows=1024):
    """q: (B, q_dim). Returns float32 (B, x_dim); `.double()` is a host-side upcast.

    NOTE: at tiny batches (B~8) plain jnp is faster than any kernel launch; this kernel
    pays off once the batch axis is large enough to amortize the ~0.35 us/grid-step.
    """
    B, q_dim = q.shape
    assert q_dim == params["q_dim"]
    hid_p, x_dim = params["hid_p"], params["x_dim"]
    w1_p, b1_p = params["w1"], params["b1"]
    w2_p, b2_p = params["w2"], params["b2"]
    w3_p = params["w3"]
    param_dtype = w1_p.dtype

    # --- batch tiling: bm rows per grid step (multiple of 8); pad batch, never assert.
    bm = min(_round_up(block_rows, _SUBLANE), _round_up(B, _SUBLANE))
    n_tiles = pl.cdiv(B, bm)
    if n_tiles > 1 and n_tiles % 2 == 1:
        # v7x has 2 TensorCores sharing the "parallel" batch axis: prefer an even tile
        # count so neither core idles on the trailing tile (no-op on v5e/v6e).
        bm = _round_up(pl.cdiv(B, n_tiles + 1), _SUBLANE)
        n_tiles = pl.cdiv(B, bm)
    Bp = n_tiles * bm

    q_f32 = q.astype(jnp.float32)
    q_pad = q_f32 if Bp == B else jnp.pad(q_f32, ((0, Bp - B), (0, 0)))

    # --- VMEM budget: double-buffered q/out tiles + resident params + h1/h2 intermediates,
    #     clamped to physical VMEM (v7x has only 64 MiB) minus headroom.
    itemsize = jnp.dtype(param_dtype).itemsize
    weight_bytes = (w1_p.size + w2_p.size + w3_p.size) * itemsize + (b1_p.size + b2_p.size) * 4
    vmem_est = (2 * bm * q_dim * 4          # q tiles (double-buffered)
                + 2 * bm * x_dim * 4        # out tiles (double-buffered)
                + 2 * bm * hid_p * 4        # h1 / h2 intermediates
                + weight_bytes)             # resident weights + biases
    try:
        vmem_cap = pltpu.get_tpu_info().vmem_capacity_bytes
    except Exception:
        vmem_cap = 64 * 1024 * 1024
    vmem_limit = int(min(max(32 * 1024 * 1024, 2 * vmem_est), vmem_cap - (2 << 20)))

    # Grid-invariant params stay resident in VMEM (single copy, not pipelined).
    resident = pl.BlockSpec(memory_space=pltpu.MemorySpace.VMEM)

    hid = params["hid"]
    cost = pl.CostEstimate(
        flops=2 * B * (q_dim * hid + hid * hid + hid * x_dim),
        transcendentals=0,
        bytes_accessed=B * q_dim * 4 + B * x_dim * 4 + weight_bytes,
    )

    out_pad = pl.pallas_call(
        decoder_sv_kernel,
        out_shape=jax.ShapeDtypeStruct((Bp, x_dim), jnp.float32),
        grid_spec=pltpu.PrefetchScalarGridSpec(
            num_scalar_prefetch=0,
            grid=(n_tiles,),
            in_specs=[
                # q tile: full (narrow) last dim == array dim -> legal, no lane padding.
                pl.BlockSpec((bm, q_dim), lambda i: (i, 0)),
                resident,   # W1 (q_dim, hid_p)
                resident,   # b1 (1, hid_p)
                resident,   # W2 (hid_p, hid_p)
                resident,   # b2 (1, hid_p)
                resident,   # W3 (hid_p, x_dim)  -- no bias
            ],
            # Output at native x_dim width (masked vst; stores have slack here).
            out_specs=pl.BlockSpec((bm, x_dim), lambda i: (i, 0)),
        ),
        compiler_params=pltpu.CompilerParams(
            dimension_semantics=("parallel",),   # batch tiles shard across TCs (v7x)
            vmem_limit_bytes=vmem_limit,
        ),
        cost_estimate=cost,
    )(q_pad, w1_p, b1_p, w2_p, b2_p, w3_p)

    return out_pad if Bp == B else out_pad[:B]


def reference_forward(q, w1, b1, w2, b2, w3):
    qf = q.astype(jnp.float32)
    h1 = jnp.maximum(qf @ w1 + b1, 0.0)
    h2 = jnp.maximum(h1 @ w2 + b2, 0.0)
    return h2 @ w3


if __name__ == "__main__":
    # DecoderSV shapes: q_dim=4, hid_units=32, x_dim=16, batch=8.
    B, q_dim, hid, x_dim = 8, 4, 32, 16

    key = jax.random.PRNGKey(0)
    kq, k1, kb1, k2, kb2, k3 = jax.random.split(key, 6)

    q = jax.random.normal(kq, (B, q_dim), dtype=jnp.float32)
    w1 = jax.random.normal(k1, (q_dim, hid), dtype=jnp.float32) * 0.1
    b1 = jax.random.normal(kb1, (hid,), dtype=jnp.float32) * 0.1
    w2 = jax.random.normal(k2, (hid, hid), dtype=jnp.float32) * 0.1
    b2 = jax.random.normal(kb2, (hid,), dtype=jnp.float32) * 0.1
    w3 = jax.random.normal(k3, (hid, x_dim), dtype=jnp.float32) * 0.1

    ref = reference_forward(q, w1, b1, w2, b2, w3)

    # f32 path: exact parity with the reference (params prepared once, reused per call).
    params_f32 = prepare_decoder_params(w1, b1, w2, b2, w3)
    out = jax.block_until_ready(decoder_sv_forward(q, params_f32))
    assert out.shape == (B, x_dim)
    assert jnp.allclose(out, ref, atol=1e-5, rtol=1e-5)

    # PyTorch's trailing `.double()`: host-side upcast of the f32 results.
    out64 = np.asarray(out).astype(np.float64)
    assert out64.dtype == np.float64 and out64.shape == (B, x_dim)

    # Multi-tile / padded-batch path (exercises masked output stores + row padding).
    B2 = 300
    q2 = jax.random.normal(jax.random.PRNGKey(1), (B2, q_dim), dtype=jnp.float32)
    out2 = jax.block_until_ready(decoder_sv_forward(q2, params_f32, block_rows=128))
    ref2 = reference_forward(q2, w1, b1, w2, b2, w3)
    assert out2.shape == (B2, x_dim)
    assert jnp.allclose(out2, ref2, atol=1e-5, rtol=1e-5)

    # bf16-operand fast path (native MXU throughput on v5e/v6e/v7x), f32 accumulation.
    # Note: activations are also cast to bf16 right before each dot, so tolerance is loose.
    params_bf16 = prepare_decoder_params(w1, b1, w2, b2, w3, param_dtype=jnp.bfloat16)
    out_bf16 = jax.block_until_ready(decoder_sv_forward(q, params_bf16))
    assert jnp.allclose(out_bf16, ref, atol=5e-2, rtol=5e-2)

    print("KERNEL_OK")
</pallas_src>

<mosaic_0001>
module attributes {stable_mosaic.version = 11 : i64} {
  func.func @decoder_sv_kernel(%arg0: i32, %arg1: memref<8x4xf32, #tpu.memory_space<vmem>>, %arg2: memref<4x128xf32, #tpu.memory_space<vmem>>, %arg3: memref<1x128xf32, #tpu.memory_space<vmem>>, %arg4: memref<128x128xf32, #tpu.memory_space<vmem>>, %arg5: memref<1x128xf32, #tpu.memory_space<vmem>>, %arg6: memref<128x16xf32, #tpu.memory_space<vmem>>, %arg7: memref<8x16xf32, #tpu.memory_space<vmem>>) attributes {dimension_semantics = [#tpu.dimension_semantics<parallel>], iteration_bounds = array<i64: 1>, scalar_prefetch = 0 : i64, scratch_operands = 0 : i64, tpu.core_type = #tpu.core_type<tc>, window_params = [{transform_indices = @transform_0, window_bounds = array<i64: 8, 4>}, {pipeline_mode = #tpu.pipeline_mode<synchronous>, transform_indices = @transform_1, window_bounds = array<i64: 4, 128>}, {pipeline_mode = #tpu.pipeline_mode<synchronous>, transform_indices = @transform_2, window_bounds = array<i64: 1, 128>}, {pipeline_mode = #tpu.pipeline_mode<synchronous>, transform_indices = @transform_3, window_bounds = array<i64: 128, 128>}, {pipeline_mode = #tpu.pipeline_mode<synchronous>, transform_indices = @transform_4, window_bounds = array<i64: 1, 128>}, {pipeline_mode = #tpu.pipeline_mode<synchronous>, transform_indices = @transform_5, window_bounds = array<i64: 128, 16>}, {transform_indices = @transform_6, window_bounds = array<i64: 8, 16>}]} {
    %c0 = arith.constant 0 : index
    %c0_0 = arith.constant 0 : index
    %0 = vector.load %arg1[%c0, %c0_0] : memref<8x4xf32, #tpu.memory_space<vmem>>, vector<8x4xf32>
    %c0_1 = arith.constant 0 : index
    %c0_2 = arith.constant 0 : index
    %1 = vector.load %arg2[%c0_1, %c0_2] : memref<4x128xf32, #tpu.memory_space<vmem>>, vector<4x128xf32>
    %cst = arith.constant dense<0.000000e+00> : vector<8x128xf32>
    %2 = tpu.matmul %0, %1, %cst {dimension_numbers = #tpu.dot_dimension_numbers<[1], [0], [0], [1], [0, 0, 1, 1], [], []>} : vector<8x4xf32>, vector<4x128xf32>, vector<8x128xf32> -> vector<8x128xf32>
    %c0_3 = arith.constant 0 : index
    %c0_4 = arith.constant 0 : index
    %3 = vector.load %arg3[%c0_3, %c0_4] : memref<1x128xf32, #tpu.memory_space<vmem>>, vector<1x128xf32>
    %4 = vector.broadcast %3 : vector<1x128xf32> to vector<8x128xf32>
    %5 = arith.addf %2, %4 : vector<8x128xf32>
    %cst_5 = arith.constant 0.000000e+00 : f32
    %6 = vector.broadcast %cst_5 : f32 to vector<8x128xf32>
    %7 = arith.maximumf %5, %6 : vector<8x128xf32>
    %c0_6 = arith.constant 0 : index
    %c0_7 = arith.constant 0 : index
    %8 = vector.load %arg4[%c0_6, %c0_7] : memref<128x128xf32, #tpu.memory_space<vmem>>, vector<128x128xf32>
    %cst_8 = arith.constant dense<0.000000e+00> : vector<8x128xf32>
    %9 = tpu.matmul %7, %8, %cst_8 {dimension_numbers = #tpu.dot_dimension_numbers<[1], [0], [0], [1], [0, 0, 1, 1], [], []>} : vector<8x128xf32>, vector<128x128xf32>, vector<8x128xf32> -> vector<8x128xf32>
    %c0_9 = arith.constant 0 : index
    %c0_10 = arith.constant 0 : index
    %10 = vector.load %arg5[%c0_9, %c0_10] : memref<1x128xf32, #tpu.memory_space<vmem>>, vector<1x128xf32>
    %11 = vector.broadcast %10 : vector<1x128xf32> to vector<8x128xf32>
    %12 = arith.addf %9, %11 : vector<8x128xf32>
    %cst_11 = arith.constant 0.000000e+00 : f32
    %13 = vector.broadcast %cst_11 : f32 to vector<8x128xf32>
    %14 = arith.maximumf %12, %13 : vector<8x128xf32>
    %c0_12 = arith.constant 0 : index
    %c0_13 = arith.constant 0 : index
    %15 = vector.load %arg6[%c0_12, %c0_13] : memref<128x16xf32, #tpu.memory_space<vmem>>, vector<128x16xf32>
    %cst_14 = arith.constant dense<0.000000e+00> : vector<8x16xf32>
    %16 = tpu.matmul %14, %15, %cst_14 {dimension_numbers = #tpu.dot_dimension_numbers<[1], [0], [0], [1], [0, 0, 1, 1], [], []>} : vector<8x128xf32>, vector<128x16xf32>, vector<8x16xf32> -> vector<8x16xf32>
    %c0_15 = arith.constant 0 : index
    %c0_16 = arith.constant 0 : index
    %17 = vector.load %arg7[%c0_15, %c0_16] : memref<8x16xf32, #tpu.memory_space<vmem>>, vector<8x16xf32>
    tpu.vector_store %arg7[%c0_15, %c0_16], %16 {strides = array<i32>} : memref<8x16xf32, #tpu.memory_space<vmem>>, vector<8x16xf32>,
    return
  }
  func.func @transform_0(%arg0: i32) -> (i32, i32) {
    %c0_i32 = arith.constant 0 : i32
    %c0_i32_0 = arith.constant 0 : i32
    return %arg0, %c0_i32 : i32, i32
  }
  func.func @transform_1(%arg0: i32) -> (i32, i32) {
    %c0_i32 = arith.constant 0 : i32
    %c0_i32_0 = arith.constant 0 : i32
    %c0_i32_1 = arith.constant 0 : i32
    return %c0_i32, %c0_i32_0 : i32, i32
  }
  func.func @transform_2(%arg0: i32) -> (i32, i32) {
    %c0_i32 = arith.constant 0 : i32
    %c0_i32_0 = arith.constant 0 : i32
    %c0_i32_1 = arith.constant 0 : i32
    return %c0_i32, %c0_i32_0 : i32, i32
  }
  func.func @transform_3(%arg0: i32) -> (i32, i32) {
    %c0_i32 = arith.constant 0 : i32
    %c0_i32_0 = arith.constant 0 : i32
    %c0_i32_1 = arith.constant 0 : i32
    return %c0_i32, %c0_i32_0 : i32, i32
  }
  func.func @transform_4(%arg0: i32) -> (i32, i32) {
    %c0_i32 = arith.constant 0 : i32
    %c0_i32_0 = arith.constant 0 : i32
    %c0_i32_1 = arith.constant 0 : i32
    return %c0_i32, %c0_i32_0 : i32, i32
  }
  func.func @transform_5(%arg0: i32) -> (i32, i32) {
    %c0_i32 = arith.constant 0 : i32
    %c0_i32_0 = arith.constant 0 : i32
    %c0_i32_1 = arith.constant 0 : i32
    return %c0_i32, %c0_i32_0 : i32, i32
  }
  func.func @transform_6(%arg0: i32) -> (i32, i32) {
    %c0_i32 = arith.constant 0 : i32
    %c0_i32_0 = arith.constant 0 : i32
    return %arg0, %c0_i32 : i32, i32
  }
}

</mosaic_0001>

<bundles_post_ra>
// kernel: tpu_custom_call.1
= control target key start
LH: loop header
LB: loop body
LE: loop exit
PB: predicated region body
PF: predicated region fallthrough
CT: control target
= control target key end

     0   :  { %vm37_vm0 = vcmask 1043456   ;;  %v499_v2 = vmov 0.0   ;;  %vm500_vm1 = vmmov 0   ;;  %vm33_vm2 = vcmask 31744   ;;  %s677_s0 = inlined_call_operand.vmem [shape: f32[8,4], index: 0, kind: input, shape index: {}]   ;;  %s678_s1 = inlined_call_operand.vmem [shape: f32[4,128], index: 1, kind: input, shape index: {}]   ;;  %s679_s2 = inlined_call_operand.vmem [shape: f32[1,128], index: 2, kind: input, shape index: {}]   ;;  %s680_s3 = inlined_call_operand.vmem [shape: f32[128,128], index: 3, kind: input, shape index: {}]   ;;  %s681_s4 = inlined_call_operand.vmem [shape: f32[1,128], index: 4, kind: input, shape index: {}]   ;;  %s682_s5 = inlined_call_operand.vmem [shape: f32[128,16], index: 5, kind: input, shape index: {}]   ;;  %s683_s6 = inlined_call_operand.hbm [shape: f32[8,16], index: 6, kind: output, shape index: {}]  }
   0x1   :  { %v25_v0 = vld [vmem:[%s678_s1] sm:$0xf]  ;;  %348 = vmatprep.subr.mxu0 %v499_v2  ;;  %350 = vmatprep.mubr.msk.f32.mxu0 %vm500_vm1, %v499_v2  ;;  %v113_v4 = vld [vmem:[%s680_s3 + $0x8] sm:$0xff]  ;;  %v114_v5 = vld [vmem:[%s680_s3 + $0x10] sm:$0xff]  ;;  %v501_v6 = vmov 0.0|0.0  }
   0x2   :  { %v24_v1 = vld [vmem:[%s677_s0] sm:$0xff]  ;;  %349 = vmatpush3.msk.msra.mxu0 %vm37_vm0, %v25_v0  ;;  %423 = vmatprep.subr.bf16.mxu1 %v501_v6  ;;  %v115_v8 = vld [vmem:[%s680_s3 + $0x18] sm:$0xff]  ;;  %v117_v11 = vld [vmem:[%s680_s3 + $0x28] sm:$0xff] }
   0x3   :  { %v112_v3 = vld [vmem:[%s680_s3] sm:$0xff]  ;;  %351 = vmatmul.mubr.msk.f32.vlgmr.msra.gmra.mrb[0].mxu0 %vm33_vm2, %v24_v1  ;;  %385 = vmatprep.mubr.msk.f32.mxu1 %vm500_vm1, %v499_v2  ;;  %v427_v9 = vpack.c.bf16 %v115_v8, %v114_v5 }
   0x4   :  { %v424_v7 = vpack.c.bf16 %v113_v4, %v112_v3  ;;  %447 = vmatprep.subr.bf16.mxu0 %v501_v6  ;;  %v116_v10 = vld [vmem:[%s680_s3 + $0x20] sm:$0xff]  ;;  %420 = vmatprep.mubr.msk.f32.mxu0 %vm500_vm1, %v499_v2 }
   0x6   :  { %425 = vmatpush3.bf16.msra.mxu1 %v424_v7 }
   0x7   :  { %426 = vmatprep.subr.bf16.mxu1 %v501_v6 }
   0x8   :  { %11 = vsyncpa [#allocation3], 0  ;;  %v430_v12 = vpack.c.bf16 %v117_v11, %v116_v10  ;;  %v118_v13 = vld [vmem:[%s680_s3 + $0x30] sm:$0xff]  ;;  %v119_v14 = vld [vmem:[%s680_s3 + $0x38] sm:$0xff]  ;;  %vm292_vm3 = vcmask 130048  }
   0x9   :  { %v433_v15 = vpack.c.bf16 %v119_v14, %v118_v13  ;;  %v120_v16 = vld [vmem:[%s680_s3 + $0x40] sm:$0xff]  ;;  %v121_v17 = vld [vmem:[%s680_s3 + $0x48] sm:$0xff]  ;;  %v122_v19 = vld [vmem:[%s680_s3 + $0x50] sm:$0xff] }
   0xa   :  { %428 = vmatpush3.bf16.msra.mxu1 %v427_v9  ;;  %v436_v18 = vpack.c.bf16 %v121_v17, %v120_v16  ;;  %v123_v20 = vld [vmem:[%s680_s3 + $0x58] sm:$0xff]  ;;  %v124_v22 = vld [vmem:[%s680_s3 + $0x60] sm:$0xff]  ;;  %v125_v23 = vld [vmem:[%s680_s3 + $0x68] sm:$0xff] }
   0xb   :  { %429 = vmatprep.subr.bf16.mxu1 %v501_v6  ;;  %v439_v21 = vpack.c.bf16 %v123_v20, %v122_v19  ;;  %v442_v24 = vpack.c.bf16 %v125_v23, %v124_v22  ;;  %v126_v25 = vld [vmem:[%s680_s3 + $0x70] sm:$0xff]  ;;  %v127_v26 = vld [vmem:[%s680_s3 + $0x78] sm:$0xff]  ;;  %v206_v28 = vld [vmem:[%s682_s5] sm:$0xff] }
   0xc   :  { %v445_v27 = vpack.c.bf16 %v127_v26, %v126_v25  ;;  %v207_v29 = vld [vmem:[%s682_s5 + $0x8] sm:$0xff]  ;;  %v208_v30 = vld [vmem:[%s682_s5 + $0x10] sm:$0xff]  ;;  %v209_v32 = vld [vmem:[%s682_s5 + $0x18] sm:$0xff] }
   0xd   :  { %v448_v31 = vpack.c.bf16 %v207_v29, %v206_v28  ;;  %v451_v33 = vpack.c.bf16 %v209_v32, %v208_v30  ;;  %v210_v34 = vld [vmem:[%s682_s5 + $0x20] sm:$0xff]  ;;  %v211_v35 = vld [vmem:[%s682_s5 + $0x28] sm:$0xff]  ;;  %v212_v37 = vld [vmem:[%s682_s5 + $0x30] sm:$0xff] }
   0xe   :  { %431 = vmatpush3.bf16.msra.mxu1 %v430_v12  ;;  %v454_v36 = vpack.c.bf16 %v211_v35, %v210_v34  ;;  %v213_v38 = vld [vmem:[%s682_s5 + $0x38] sm:$0xff]  ;;  %v214_v40 = vld [vmem:[%s682_s5 + $0x40] sm:$0xff]  ;;  %v215_v41 = vld [vmem:[%s682_s5 + $0x48] sm:$0xff] }
   0xf   :  { %432 = vmatprep.subr.bf16.mxu1 %v501_v6  ;;  %449 = vmatpush3.bf16.msra.mxu0 %v448_v31  ;;  %v457_v39 = vpack.c.bf16 %v213_v38, %v212_v37  ;;  %v460_v42 = vpack.c.bf16 %v215_v41, %v214_v40  ;;  %v216_v43 = vld [vmem:[%s682_s5 + $0x50] sm:$0xff]  ;;  %v217_v44 = vld [vmem:[%s682_s5 + $0x58] sm:$0xff]  ;;  %v218_v46 = vld [vmem:[%s682_s5 + $0x60] sm:$0xff] }
  0x10   :  { %450 = vmatprep.subr.bf16.mxu0 %v501_v6  ;;  %v463_v45 = vpack.c.bf16 %v217_v44, %v216_v43  ;;  %v219_v47 = vld [vmem:[%s682_s5 + $0x68] sm:$0xff]  ;;  %v308_v49 = vld [vmem:[%s679_s2] ss:$0 sm:$0xff]  ;;  %v220_v54 = vld [vmem:[%s682_s5 + $0x70] sm:$0xff]  ;;  %s502_s2 = smov [#allocation2]  }
  0x11   :  { %v466_v48 = vpack.c.bf16 %v219_v47, %v218_v46  ;;  %v221_v55 = vld [vmem:[%s682_s5 + $0x78] sm:$0xff]  ;;  %v311_v57 = vld [vmem:[%s681_s4] ss:$0 sm:$0xff]  ;;  %s300_s13 = sshll.u32 %s502_s2, 4  ;;  %s301_s13 = int_to_ptr.vmem [resolvable:$true] %s300_s13 }
  0x12   :  { %434 = vmatpush3.bf16.msra.mxu1 %v433_v15  ;;  %v469_v56 = vpack.c.bf16 %v221_v55, %v220_v54  ;;  %s475_s14 = scalar_lea.vmem %s301_s13, 128  ;;  %p480_p1 = scmp.lt.s32.totalorder %s301_s13, %s301_s13 }
  0x13   :  { %435 = vmatprep.subr.bf16.mxu1 %v501_v6  ;;  %452 = vmatpush3.bf16.msra.mxu0 %v451_v33  ;;  %p476_p0 = scmp.ne.s32.totalorder %s301_s13, %s475_s14  ;;  %p481_p2 = scmp.lt.s32.totalorder %s475_s14, %s475_s14 }
  0x14   :  { %453 = vmatprep.subr.bf16.mxu0 %v501_v6 }
  0x15   :  { %p482_p3 = por %p481_p2, %p480_p1 }
  0x16   :  { %437 = vmatpush3.bf16.msra.mxu1 %v436_v18 }
  0x17   :  { %438 = vmatprep.subr.bf16.mxu1 %v501_v6  ;;  %455 = vmatpush3.bf16.msra.mxu0 %v454_v36  ;;  %p483_p4 = pnand %p482_p3, %p476_p0 }
  0x18   :  { %456 = vmatprep.subr.bf16.mxu0 %v501_v6 }
  0x1a   :  { %440 = vmatpush3.bf16.msra.mxu1 %v439_v21 }
  0x1b   :  { %441 = vmatprep.subr.bf16.mxu1 %v501_v6  ;;  %458 = vmatpush3.bf16.msra.mxu0 %v457_v39 }
  0x1c   :  { %459 = vmatprep.subr.bf16.mxu0 %v501_v6 }
  0x1e   :  { %443 = vmatpush3.bf16.msra.mxu1 %v442_v24 }
  0x1f   :  { %444 = vmatprep.subr.bf16.mxu1 %v501_v6  ;;  %461 = vmatpush3.bf16.msra.mxu0 %v460_v42 }
  0x20   :  { %462 = vmatprep.subr.bf16.mxu0 %v501_v6 }
  0x22   :  { %446 = vmatpush3.bf16.msra.mxu1 %v445_v27 }
  0x23   :  { %464 = vmatpush3.bf16.msra.mxu0 %v463_v45 }
  0x24   :  { %465 = vmatprep.subr.bf16.mxu0 %v501_v6 }
  0x27   :  { %467 = vmatpush3.bf16.msra.mxu0 %v466_v48 }
  0x28   :  { %468 = vmatprep.subr.bf16.mxu0 %v501_v6 }
  0x2b   :  { %470 = vmatpush3.bf16.msra.mxu0 %v469_v56 }
  0xd6   :  { %v107_v50 = vpop.f32.mrb[0].mxu0 }
  0xd7   :  { %v108_v51 = vadd.f32 %v308_v49, %v107_v50  ;;  %v352_v52 = vpop.f32.mrb[1].mxu0 }
  0xd9   :  { %v111_v53 = vmax.f32 %v108_v51, 0.0 }
  0xdb   :  { %386 = vmatmul.mubr.f32.vlgmr.msra.gmra.mrb[0].mxu1 %v111_v53 }
 0x1ae   :  { %v201_v58 = vpop.f32.mrb[0].mxu1 }
 0x1af   :  { %v202_v59 = vadd.f32 %v311_v57, %v201_v58  ;;  %v387_v60 = vpop.f32.mrb[1].mxu1 }
 0x1b1   :  { %v205_v61 = vmax.f32 %v202_v59, 0.0 }
 0x1b3   :  { %421 = vmatmul.mubr.f32.vlgmr.msra.gmra.mrb[2].mxu0 %v205_v61 }
 0x286   :  { %v288_v62 = vpop.f32.mrb[2].mxu0 }
 0x287   :  { %293 = vst.msk [vmem:[#allocation2] sm:$0xff] %vm292_vm3, %v288_v62  ;;  %v422_v63 = vpop.f32.mrb[3].mxu0 }
 0x288   :  { %486 = shalt.err (!%p483_p4)
}
 0x289   :  { %s487_s15 = scalar_lea.hbm %s683_s6, 128 }
 0x28a   :  { %p488_p5 = scmp.ne.s32.totalorder %s683_s6, %s487_s15  ;;  %p491_p6 = scmp.lt.u32.totalorder %s487_s15, %s683_s6 }
 0x28c   :  { %p493_p7 = pnand %p491_p6, %p488_p5 }
 0x28e   :  { %496 = shalt.err (!%p493_p7)
}
 0x28f   :  { %303 = dma.vmem_to_hbm [thread:$0]  %s301_s13, 128, %s683_s6, [#allocation3]  }
 0x290   :  { %497 = dma.done.wait [#allocation3], 128  }
 0x291   :  { %498 = vsyncadd [#allocation3], 4294967168 }
 0x292   :  { %307 = vsyncpa [#allocation3], 1 }

</bundles_post_ra>
